<compile_context>
chip_gen: v7x
topology: tpu7x:2x2x1
jax: 0.10.0
libtpu: 0.0.40
codegen_flags: <defaults>
</compile_context>

<pallas_src>
import jax
import jax.numpy as jnp
import numpy as np
from jax.experimental import pallas as pl
from jax.experimental.pallas import tpu as pltpu


# --------------- fused embedding + input-projection gate kernel ---------------

def _gates_x_kernel(idx_ref, tbl_ref, bias_ref, out_ref):
    # ids already carry per-feature vocab offsets; one multi-hot
    # (N, Vtot) @ (Vtot, 8H) MXU matmul replaces all embedding lookups + x@W_ih.
    idx = idx_ref[...]                                    # (N, F) int32
    n, nf = idx.shape
    v = tbl_ref.shape[0]
    iota_v = jax.lax.broadcasted_iota(jnp.int32, (n, v), 1)
    mhot = jnp.zeros((n, v), jnp.float32)
    for f in range(nf):                                   # static, tiny loop
        mhot = mhot + (iota_v == idx[:, f:f + 1]).astype(jnp.float32)
    out_ref[...] = (jnp.dot(mhot, tbl_ref[...], preferred_element_type=jnp.float32)
                    + bias_ref[...])


def gates_x_lookup(ids_flat, gate_table, gate_bias):
    """ids_flat: (N, F) int32 (vocab offsets applied), gate_table: (Vtot, 8H),
    gate_bias: (1, 8H).  Returns gates_x: (N, 8H) f32 (both directions)."""
    n = ids_flat.shape[0]
    eight_h = gate_table.shape[1]
    return pl.pallas_call(
        _gates_x_kernel,
        out_shape=jax.ShapeDtypeStruct((n, eight_h), jnp.float32),
    )(ids_flat.astype(jnp.int32), gate_table, gate_bias)


# -------------------------- bidirectional LSTM kernel --------------------------

def _bilstm_kernel(gx_ref, whh_ref, out_ref, hN_ref, cN_ref, out_sc):
    d = pl.program_id(0)                                  # direction (0 fwd, 1 bwd)
    T, B, four_h = gx_ref.shape
    H = four_h // 4
    w_hh = whh_ref[0]                                     # (H, 4H), loaded once

    h = jnp.zeros((B, H), jnp.float32)                    # recurrent state in vregs
    c = jnp.zeros((B, H), jnp.float32)

    # T is static & small: fully unrolled at trace time (equivalent to
    # lax.fori_loop(..., unroll=True)); switch to a rolled fori_loop for long T.
    for tt in range(T):
        t = d * (T - 1 - 2 * tt) + tt                     # fwd: tt ; bwd: T-1-tt
        gates = gx_ref[t] + jnp.dot(h, w_hh, preferred_element_type=jnp.float32)
        i = jax.nn.sigmoid(gates[:, 0 * H:1 * H])
        f = jax.nn.sigmoid(gates[:, 1 * H:2 * H])
        g = jnp.tanh(gates[:, 2 * H:3 * H])
        o = jax.nn.sigmoid(gates[:, 3 * H:4 * H])
        c = f * c + i * g
        h = o * jnp.tanh(c)
        out_sc[t] = h                                     # buffered in VMEM scratch

    out_ref[...] = out_sc[...][None]                      # one writeback per direction
    hN_ref[...] = h[None]                                 # final states stored once
    cN_ref[...] = c[None]


def bidirectional_lstm(gates_x_tm, w_hh):
    """gates_x_tm: (T, B, 8H) precomputed input-gate contributions (fwd | bwd);
    w_hh: (2, H, 4H).  Returns outputs (B, T, 2H) and (h_n, c_n) each (2, B, H)."""
    T, B, eight_h = gates_x_tm.shape
    H = w_hh.shape[1]
    outs, h_n, c_n = pl.pallas_call(
        _bilstm_kernel,
        out_shape=(
            jax.ShapeDtypeStruct((2, T, B, H), jnp.float32),
            jax.ShapeDtypeStruct((2, B, H), jnp.float32),
            jax.ShapeDtypeStruct((2, B, H), jnp.float32),
        ),
        grid_spec=pltpu.PrefetchScalarGridSpec(
            num_scalar_prefetch=0,
            grid=(2,),                                    # one grid step per direction
            in_specs=[
                pl.BlockSpec((T, B, 4 * H), lambda d: (0, 0, d)),   # direction's 4H slice
                pl.BlockSpec((1, H, 4 * H), lambda d: (d, 0, 0)),
            ],
            out_specs=[
                pl.BlockSpec((1, T, B, H), lambda d: (d, 0, 0, 0)),
                pl.BlockSpec((1, B, H), lambda d: (d, 0, 0)),
                pl.BlockSpec((1, B, H), lambda d: (d, 0, 0)),
            ],
            scratch_shapes=[pltpu.VMEM((T, B, H), jnp.float32)],
        ),
        compiler_params=pltpu.CompilerParams(
            dimension_semantics=("parallel",)),           # both TCs on v7x; no-op elsewhere
    )(gates_x_tm, w_hh)

    # (2, T, B, H) -> (B, T, 2H) (fwd half then bwd half, PyTorch order).
    # TODO(synk): tiny layout fix-up left to XLA; H=32 < 128 lanes prevents a
    # direct (B, T, 2, H) kernel-output BlockSpec per direction.
    outputs = jnp.transpose(outs, (2, 1, 0, 3)).reshape(B, T, 2 * H)
    return outputs, (h_n, c_n)


# --------------------------------- full module ---------------------------------

class FeatureRichEncoderPallas:
    def __init__(self, input_sizes, hidden_size, num_layers=1, dropout=0.1, key=None):
        assert num_layers == 1  # TODO(synk): multi-layer LSTM stacking not implemented (module default is 1)
        self.input_sizes = list(input_sizes)
        self.H = hidden_size
        self.D = hidden_size * len(input_sizes)
        key = jax.random.PRNGKey(42) if key is None else key
        ks = jax.random.split(key, len(input_sizes) + 4)

        # nn.Embedding(padding_idx=0): N(0,1) init with row 0 zeroed.
        self.emb_weights = []
        for f, V in enumerate(self.input_sizes):
            w = jax.random.normal(ks[f], (V, hidden_size), jnp.float32)
            w = w.at[0].set(0.0)
            self.emb_weights.append(w)

        # nn.LSTM init: U(-1/sqrt(H), 1/sqrt(H)); stored transposed per direction.
        s = 1.0 / np.sqrt(hidden_size)
        kw = ks[len(input_sizes):]
        self.w_ih = jax.random.uniform(kw[0], (2, self.D, 4 * self.H), jnp.float32, -s, s)
        self.w_hh = jax.random.uniform(kw[1], (2, self.H, 4 * self.H), jnp.float32, -s, s)
        b_ih = jax.random.uniform(kw[2], (2, 4 * self.H), jnp.float32, -s, s)
        b_hh = jax.random.uniform(kw[3], (2, 4 * self.H), jnp.float32, -s, s)
        self.b = b_ih + b_hh                              # (2, 4H)

        # Fold embeddings into the input projection (parameter-only precompute):
        #   gate_table[off_f + id, :4H] = emb_f[id] @ w_ih[0, f*H:(f+1)*H]
        #   gate_table[off_f + id, 4H:] = emb_f[id] @ w_ih[1, f*H:(f+1)*H]
        offs = [0]
        for V in self.input_sizes[:-1]:
            offs.append(offs[-1] + V)
        self.vocab_offsets = offs
        H = self.H
        rows = []
        for f in range(len(self.input_sizes)):
            w_f = jnp.concatenate([self.w_ih[0, f * H:(f + 1) * H, :],
                                   self.w_ih[1, f * H:(f + 1) * H, :]], axis=-1)    # (H, 8H)
            rows.append(jnp.dot(self.emb_weights[f], w_f))                          # (V_f, 8H)
        self.gate_table = jnp.concatenate(rows, axis=0)                             # (Vtot, 8H)
        self.gate_bias = jnp.concatenate([self.b[0], self.b[1]], axis=-1)[None, :]  # (1, 8H)

    def __call__(self, inputs):
        # nn.Dropout is identity in eval mode (deterministic forward).
        B, T = inputs[0].shape
        # time-major (T*B, F) ids with per-feature vocab offsets applied
        ids_tm = jnp.stack(
            [jnp.transpose(inp).astype(jnp.int32) + off
             for inp, off in zip(inputs, self.vocab_offsets)], axis=-1)   # (T, B, F)
        ids_flat = ids_tm.reshape(T * B, len(self.input_sizes))
        gates_x = gates_x_lookup(ids_flat, self.gate_table, self.gate_bias)   # (T*B, 8H)
        gates_x = gates_x.reshape(T, B, 8 * self.H)                           # free reshape
        outputs, (hidden, cell) = bidirectional_lstm(gates_x, self.w_hh)
        return outputs, (hidden, cell)


# ------------------------------ pure-JAX reference ------------------------------

def _ref_forward(inputs, enc):
    embs = [enc.emb_weights[f][inputs[f]] for f in range(len(inputs))]
    x = jnp.concatenate(embs, axis=-1)                    # (B, T, D)
    B, T, _ = x.shape
    H = enc.H

    def run(d, xs):
        def step(carry, xt):
            h, c = carry
            gates = xt @ enc.w_ih[d] + h @ enc.w_hh[d] + enc.b[d]
            i = jax.nn.sigmoid(gates[:, :H])
            f = jax.nn.sigmoid(gates[:, H:2 * H])
            g = jnp.tanh(gates[:, 2 * H:3 * H])
            o = jax.nn.sigmoid(gates[:, 3 * H:])
            c = f * c + i * g
            h = o * jnp.tanh(c)
            return (h, c), h
        init = (jnp.zeros((B, H), jnp.float32), jnp.zeros((B, H), jnp.float32))
        (hN, cN), hs = jax.lax.scan(step, init, xs)
        return hs, hN, cN

    xs = jnp.transpose(x, (1, 0, 2))
    hf, hNf, cNf = run(0, xs)
    hb, hNb, cNb = run(1, xs[::-1])
    hb = hb[::-1]
    outputs = jnp.concatenate(
        [jnp.transpose(hf, (1, 0, 2)), jnp.transpose(hb, (1, 0, 2))], axis=-1)
    return outputs, (jnp.stack([hNf, hNb]), jnp.stack([cNf, cNb]))


# ------------------------------------ main ---------------------------------------

if __name__ == "__main__":
    B, T, H = 2, 8, 32
    input_sizes = [11, 7, 5]

    enc = FeatureRichEncoderPallas(input_sizes, H, num_layers=1, dropout=0.1,
                                   key=jax.random.PRNGKey(42))

    key = jax.random.PRNGKey(0)
    keys = jax.random.split(key, len(input_sizes))
    inputs = [jax.random.randint(k, (B, T), 0, v, dtype=jnp.int32)
              for k, v in zip(keys, input_sizes)]

    outputs, (hidden, cell) = enc(inputs)
    jax.block_until_ready((outputs, hidden, cell))

    assert outputs.shape == (B, T, 2 * H)
    assert hidden.shape == (2, B, H)
    assert cell.shape == (2, B, H)

    ref_out, (ref_h, ref_c) = _ref_forward(inputs, enc)
    np.testing.assert_allclose(np.asarray(outputs), np.asarray(ref_out), atol=1e-3, rtol=1e-3)
    np.testing.assert_allclose(np.asarray(hidden), np.asarray(ref_h), atol=1e-3, rtol=1e-3)
    np.testing.assert_allclose(np.asarray(cell), np.asarray(ref_c), atol=1e-3, rtol=1e-3)

    print("KERNEL_OK")
</pallas_src>

<mosaic_0001>
module attributes {stable_mosaic.version = 11 : i64} {
  func.func @_gates_x_kernel(%arg0: memref<16x3xi32, #tpu.memory_space<vmem>>, %arg1: memref<23x256xf32, #tpu.memory_space<vmem>>, %arg2: memref<1x256xf32, #tpu.memory_space<vmem>>, %arg3: memref<16x256xf32, #tpu.memory_space<vmem>>) attributes {dimension_semantics = [], scalar_prefetch = 0 : i64, scratch_operands = 0 : i64, tpu.core_type = #tpu.core_type<tc>} {
    %c0 = arith.constant 0 : index
    %c0_0 = arith.constant 0 : index
    %0 = vector.load %arg0[%c0, %c0_0] : memref<16x3xi32, #tpu.memory_space<vmem>>, vector<16x3xi32>
    %1 = tpu.iota {dimensions = array<i32: 1>} : vector<16x23xi32>
    %cst = arith.constant 0.000000e+00 : f32
    %2 = vector.broadcast %cst : f32 to vector<16x23xf32>
    %3 = vector.extract_strided_slice %0 {offsets = [0, 0], sizes = [16, 1], strides = [1, 1]} : vector<16x3xi32> to vector<16x1xi32>
    %4 = vector.broadcast %3 : vector<16x1xi32> to vector<16x23xi32>
    %5 = arith.cmpi eq, %1, %4 : vector<16x23xi32>
    %6 = arith.extui %5 : vector<16x23xi1> to vector<16x23xi32>
    %7 = arith.sitofp %6 : vector<16x23xi32> to vector<16x23xf32>
    %8 = arith.addf %2, %7 : vector<16x23xf32>
    %9 = vector.extract_strided_slice %0 {offsets = [0, 1], sizes = [16, 1], strides = [1, 1]} : vector<16x3xi32> to vector<16x1xi32>
    %10 = vector.broadcast %9 : vector<16x1xi32> to vector<16x23xi32>
    %11 = arith.cmpi eq, %1, %10 : vector<16x23xi32>
    %12 = arith.extui %11 : vector<16x23xi1> to vector<16x23xi32>
    %13 = arith.sitofp %12 : vector<16x23xi32> to vector<16x23xf32>
    %14 = arith.addf %8, %13 : vector<16x23xf32>
    %15 = vector.extract_strided_slice %0 {offsets = [0, 2], sizes = [16, 1], strides = [1, 1]} : vector<16x3xi32> to vector<16x1xi32>
    %16 = vector.broadcast %15 : vector<16x1xi32> to vector<16x23xi32>
    %17 = arith.cmpi eq, %1, %16 : vector<16x23xi32>
    %18 = arith.extui %17 : vector<16x23xi1> to vector<16x23xi32>
    %19 = arith.sitofp %18 : vector<16x23xi32> to vector<16x23xf32>
    %20 = arith.addf %14, %19 : vector<16x23xf32>
    %c0_1 = arith.constant 0 : index
    %c0_2 = arith.constant 0 : index
    %21 = vector.load %arg1[%c0_1, %c0_2] : memref<23x256xf32, #tpu.memory_space<vmem>>, vector<23x256xf32>
    %cst_3 = arith.constant dense<0.000000e+00> : vector<16x256xf32>
    %22 = tpu.matmul %20, %21, %cst_3 {dimension_numbers = #tpu.dot_dimension_numbers<[1], [0], [0], [1], [0, 0, 1, 1], [], []>} : vector<16x23xf32>, vector<23x256xf32>, vector<16x256xf32> -> vector<16x256xf32>
    %c0_4 = arith.constant 0 : index
    %c0_5 = arith.constant 0 : index
    %23 = vector.load %arg2[%c0_4, %c0_5] : memref<1x256xf32, #tpu.memory_space<vmem>>, vector<1x256xf32>
    %24 = vector.broadcast %23 : vector<1x256xf32> to vector<16x256xf32>
    %25 = arith.addf %22, %24 : vector<16x256xf32>
    %c0_6 = arith.constant 0 : index
    %c0_7 = arith.constant 0 : index
    %26 = vector.load %arg3[%c0_6, %c0_7] : memref<16x256xf32, #tpu.memory_space<vmem>>, vector<16x256xf32>
    tpu.vector_store %arg3[%c0_6, %c0_7], %25 {strides = array<i32>} : memref<16x256xf32, #tpu.memory_space<vmem>>, vector<16x256xf32>,
    return
  }
}

</mosaic_0001>

<bundles_post_ra>
// kernel: tpu_custom_call.1
= control target key start
LH: loop header
LB: loop body
LE: loop exit
PB: predicated region body
PF: predicated region fallthrough
CT: control target
= control target key end

     0   :  { %8 = vsyncpa [#allocation3], 0  ;;  %s350_s0 = inlined_call_operand.vmem [shape: s32[16,3], index: 0, kind: input, shape index: {}]   ;;  %s351_s1 = inlined_call_operand.hbm [shape: f32[23,256], index: 1, kind: input, shape index: {}]   ;;  %s352_s2 = inlined_call_operand.vmem [shape: f32[1,256], index: 2, kind: input, shape index: {}]   ;;  %s353_s3 = inlined_call_operand.hbm [shape: f32[16,256], index: 3, kind: output, shape index: {}]  }
   0x1   :  { %9 = vsyncpa [#allocation4], 0  ;;  %s283_s12 = smov [#allocation2]   ;;  %s235_s16 = scalar_lea.hbm %s351_s1, 768 }
   0x2   :  { %s17_s13 = sshll.u32 %s283_s12, 4  ;;  %p236_p0 = scmp.ne.s32.totalorder %s351_s1, %s235_s16  ;;  %s18_s13 = int_to_ptr.vmem [resolvable:$true] %s17_s13 }
   0x3   :  { %p239_p1 = scmp.lt.u32.totalorder %s235_s16, %s351_s1 }
   0x5   :  { %p241_p2 = pnand %p239_p1, %p236_p0 }
   0x7   :  { %244 = shalt.err (!%p241_p2)
}
   0x8   :  { %s245_s21 = scalar_lea.vmem %s18_s13, 768  ;;  %p250_p4 = scmp.lt.s32.totalorder %s18_s13, %s18_s13 }
   0x9   :  { %p246_p3 = scmp.ne.s32.totalorder %s18_s13, %s245_s21  ;;  %p251_p5 = scmp.lt.s32.totalorder %s245_s21, %s245_s21 }
   0xb   :  { %p252_p6 = por %p251_p5, %p250_p4 }
   0xd   :  { %p253_p7 = pnand %p252_p6, %p246_p3 }
   0xf   :  { %256 = shalt.err (!%p253_p7)
}
  0x10   :  { %s284_s22 = smov 256   ;;  %s285_s23 = smov 16  }
  0x11   :  { %23 = dma.hbm_to_vmem [thread:$0]  %s351_s1, 768, %s18_s13, [#allocation3], %s284_s22, %s284_s22, %s285_s23  }
  0x12   :  { %279 = dma.done.wait [#allocation3], 768  }
  0x13   :  { %280 = vsyncadd [#allocation3], 4294966528  ;;  %v286_v0 = vmov 1   ;;  %v287_v1 = vmov 0   ;;  %v288_v2 = vmov 0.0   ;;  %v29_v3 = vld [vmem:[%s350_s0] sm:$0xff]  ;;  %v31_v14 = vlaneseq }
  0x14   :  { %232 = vset.pattern.permute.xlu1 %v286_v0  ;;  %231 = vset.pattern.permute.xlu0 %v287_v1  ;;  %v30_v4 = vld [vmem:[%s350_s0 + $0x8] sm:$0xff]  ;;  %v76_v5 = vld [vmem:[#allocation2 + $0x8] sm:$0xff]  ;;  %v75_v8 = vld [vmem:[#allocation2] sm:$0xff]  ;;  %v289_v11 = vmov 2   ;;  %vm100_vm0 = vcmask 1046528   ;;  %vm93_vm7 = vcmask 187392  }
  0x15   :  { %171 = vmatprep.mubr.f32.mxu0 %v288_v2  ;;  %177 = vmatprep.mubr.f32.mxu1 %v288_v2  ;;  %v78_v6 = vld [vmem:[#allocation2 + $0x18] sm:$0xff]  ;;  %v77_v9 = vld [vmem:[#allocation2 + $0x10] sm:$0xff]  ;;  %v80_v12 = vld [vmem:[#allocation2 + $0x28] sm:$0x7f]  ;;  %v32_v15 = vand.u32 127, %v31_v14  ;;  %v84_v32 = vshrl.u32 %v31_v14, 7 }
  0x16   :  { %48 = vperm.xlu1 %232, %v29_v3   ;;  %34 = vperm.xlu0 %231, %v29_v3   ;;  %v215_v7 = vpack.c.bf16 %v78_v6, %v76_v5  ;;  %v217_v10 = vpack.c.bf16 %v77_v9, %v75_v8  ;;  %v79_v13 = vld [vmem:[#allocation2 + $0x20] sm:$0x7f]  ;;  %v81_v34 = vld [vmem:[%s352_s2] sm:$0x3]  ;;  %s290_s30 = smov [#allocation5]  }
  0x17   :  { %v85_v33 = vsub.s32 0, %v84_v32  ;;  %v89_v35 = vsub.s32 1, %v84_v32  ;;  %s193_s4 = sshll.u32 %s290_s30, 4  ;;  %s194_s4 = int_to_ptr.vmem [resolvable:$true] %s193_s4 }
  0x18   :  { %216 = vmatprep.subr.bf16.mxu0 %v215_v7  ;;  %219 = vmatprep.subr.bf16.mxu1 %v215_v7  ;;  %s257_s5 = scalar_lea.vmem %s194_s4, 512  ;;  %p262_p9 = scmp.lt.s32.totalorder %s194_s4, %s194_s4 }
  0x19   :  { %218 = vmatpush1.bf16.msra.mxu0 %v217_v10  ;;  %221 = vmatpush1.bf16.msra.mxu1 %v217_v10  ;;  %v86_v36 = vrot.slane %v81_v34, %v85_v33  ;;  %v90_v37 = vrot.slane %v81_v34, %v89_v35  ;;  %p258_p8 = scmp.ne.s32.totalorder %s194_s4, %s257_s5  ;;  %p263_p10 = scmp.lt.s32.totalorder %s257_s5, %s257_s5 }
  0x1a   :  { %51 = vperm.xlu1 %232, %v30_v4   ;;  %37 = vperm.xlu0 %231, %v30_v4  }
  0x1b   :  { %211 = vmatprep.subr.msk.mxu0 %vm100_vm0, %v80_v12  ;;  %220 = vmatprep.subr.msk.mxu1 %vm100_vm0, %v80_v12  ;;  %p264_p11 = por %p263_p10, %p262_p9 }
  0x1d   :  { %212 = vmatpush1.msk.msra.mxu0 %vm100_vm0, %v79_v13  ;;  %222 = vmatpush1.msk.msra.mxu1 %vm100_vm0, %v79_v13  ;;  %p265_p12 = pnand %p264_p11, %p258_p8 }
  0x1e   :  { %234 = vset.pattern.permute.xlu1 %v289_v11  ;;  %233 = vset.pattern.permute.xlu0 %v289_v11 }
  0x1f   :  { %65 = vperm.xlu1 %234, %v30_v4   ;;  %62 = vperm.xlu0 %233, %v29_v3  }
  0x95   :  { %v49_v16 = vpop.permute.xlu1 %48  ;;  %v35_v17 = vpop.permute.xlu0 %34 }
  0x96   :  { %vm53_vm1 = vcmp.eq.s32.totalorder %v32_v15, %v49_v16  ;;  %vm39_vm2 = vcmp.eq.s32.totalorder %v32_v15, %v35_v17 }
  0x97   :  { %v207_v20 = vsel %vm53_vm1, 1.0, %v288_v2  ;;  %v205_v21 = vsel %vm39_vm2, 1.0, %v288_v2 }
  0x98   :  { %v59_v26 = vadd.f32 %v207_v20, %v205_v21 }
  0x99   :  { %v52_v18 = vpop.permute.xlu1 %51  ;;  %v38_v19 = vpop.permute.xlu0 %37 }
  0x9a   :  { %vm54_vm3 = vcmp.eq.s32.totalorder %v32_v15, %v52_v18  ;;  %vm40_vm4 = vcmp.eq.s32.totalorder %v32_v15, %v38_v19 }
  0x9b   :  { %v208_v22 = vsel %vm54_vm3, 1.0, %v288_v2  ;;  %v206_v23 = vsel %vm40_vm4, 1.0, %v288_v2 }
  0x9c   :  { %v60_v27 = vadd.f32 %v208_v22, %v206_v23 }
  0x9e   :  { %v66_v24 = vpop.permute.xlu1 %65  ;;  %v63_v25 = vpop.permute.xlu0 %62 }
  0x9f   :  { %vm68_vm5 = vcmp.eq.s32.totalorder %v32_v15, %v66_v24  ;;  %vm67_vm6 = vcmp.eq.s32.totalorder %v32_v15, %v63_v25 }
  0xa0   :  { %v210_v28 = vsel %vm68_vm5, 1.0, %v288_v2  ;;  %v209_v29 = vsel %vm67_vm6, 1.0, %v288_v2 }
  0xa1   :  { %v74_v30 = vadd.f32 %v210_v28, %v60_v27  ;;  %v73_v31 = vadd.f32 %v209_v29, %v59_v26 }
  0xa3   :  { %213 = vmatmul.mubr.msk.f32.vlgmr.msra.gmra.mrb[0].mxu0 %vm93_vm7, %v73_v31  ;;  %214 = vmatmul.mubr.msk.f32.vlgmr.msra.gmra.mrb[0].mxu1 %vm93_vm7, %v74_v30 }
 0x176   :  { %v173_v38 = vpop.f32.mrb[0].mxu0  ;;  %v179_v39 = vpop.f32.mrb[0].mxu1 }
 0x177   :  { %v174_v40 = vadd.f32 %v173_v38, %v86_v36  ;;  %v180_v41 = vadd.f32 %v179_v39, %v86_v36  ;;  %v175_v42 = vpop.f32.mrb[1].mxu0  ;;  %v181_v43 = vpop.f32.mrb[1].mxu1 }
 0x178   :  { %v176_v44 = vadd.f32 %v175_v42, %v90_v37  ;;  %v182_v45 = vadd.f32 %v181_v43, %v90_v37 }
 0x179   :  { %184 = vst [vmem:[#allocation5] sm:$0xff] %v174_v40  ;;  %186 = vst [vmem:[#allocation5 + $0x10] sm:$0xff] %v180_v41 }
 0x17a   :  { %185 = vst [vmem:[#allocation5 + $0x8] sm:$0xff] %v176_v44  ;;  %187 = vst [vmem:[#allocation5 + $0x18] sm:$0xff] %v182_v45 }
 0x17b   :  { %268 = shalt.err (!%p265_p12)
}
 0x17c   :  { %s269_s7 = scalar_lea.hbm %s353_s3, 512 }
 0x17d   :  { %p270_p13 = scmp.ne.s32.totalorder %s353_s3, %s269_s7  ;;  %p273_p0 = scmp.lt.u32.totalorder %s269_s7, %s353_s3 }
 0x17f   :  { %p275_p1 = pnand %p273_p0, %p270_p13 }
 0x181   :  { %278 = shalt.err (!%p275_p1)
}
 0x182   :  { %199 = dma.vmem_to_hbm [thread:$0]  %s194_s4, 512, %s353_s3, [#allocation4], %s284_s22, %s284_s22, %s285_s23  }
 0x183   :  { %281 = dma.done.wait [#allocation4], 512  }
 0x184   :  { %282 = vsyncadd [#allocation4], 4294966784 }
 0x185   :  { %203 = vsyncpa [#allocation3], 1 }
 0x186   :  { %204 = vsyncpa [#allocation4], 1 }

</bundles_post_ra>
